<compile_context>
chip_gen: v5e
topology: v5e:2x2
jax: 0.10.0
libtpu: 0.0.40
codegen_flags: <defaults>
</compile_context>

<pallas_src>
import functools

import jax
import jax.numpy as jnp
from jax.experimental import pallas as pl
from jax.experimental.pallas import tpu as pltpu

INPUT_NODES = 16   # input_nodes
NODES = 32         # nodes (hidden width)
OUT = 3            # final output width
OUT_PAD = 8        # lane-padded output width stored by the kernel


def _round_up(n, m):
    return ((n + m - 1) // m) * m


def _mlp_kernel(x_ref,
                w1_ref, b1_ref,
                w2_ref, b2_ref,
                w3_ref, b3_ref,
                w4_ref, b4_ref,
                w5_ref, b5_ref,
                o_ref):
    """Fused 5-layer MLP on one batch tile. All weights live fully in VMEM."""
    h = x_ref[...]                                                   # (bm, in)
    h = jnp.maximum(
        jnp.dot(h, w1_ref[...], preferred_element_type=jnp.float32)
        + b1_ref[...], 0.0)                                          # (bm, nodes)
    h = jnp.maximum(
        jnp.dot(h, w2_ref[...], preferred_element_type=jnp.float32)
        + b2_ref[...], 0.0)
    h = jnp.maximum(
        jnp.dot(h, w3_ref[...], preferred_element_type=jnp.float32)
        + b3_ref[...], 0.0)
    h = jnp.maximum(
        jnp.dot(h, w4_ref[...], preferred_element_type=jnp.float32)
        + b4_ref[...], 0.0)
    # Final layer, no relu; stored at OUT_PAD lanes (zero-padded columns).
    o_ref[...] = (jnp.dot(h, w5_ref[...], preferred_element_type=jnp.float32)
                  + b5_ref[...])                                     # (bm, OUT_PAD)


@functools.partial(jax.jit, static_argnames=("block_m",))
def mlp_forward(x, params, *, block_m=512):
    """x: (B, INPUT_NODES) f32. params: dict of transposed weights/biases."""
    B, in_dim = x.shape
    assert in_dim == INPUT_NODES
    assert block_m % 8 == 0

    # Effective tile: big tiles at large B (amortize grid-step overhead, fill
    # the MXU M-dim), a single grid step for tiny batches.
    bm = min(block_m, _round_up(B, 8))
    B_pad = _round_up(B, bm)
    if B_pad != B:
        x = jnp.pad(x, ((0, B_pad - B), (0, 0)))

    w1, b1 = params["w1"], params["b1"]   # (in, nodes), (1, nodes)
    w2, b2 = params["w2"], params["b2"]
    w3, b3 = params["w3"], params["b3"]
    w4, b4 = params["w4"], params["b4"]
    w5, b5 = params["w5"], params["b5"]   # (nodes, OUT_PAD), (1, OUT_PAD)

    grid = (B_pad // bm,)

    # Per-batch-tile specs; parameters are replicated (same block every step).
    x_spec = pl.BlockSpec((bm, INPUT_NODES), lambda i: (i, 0))
    o_spec = pl.BlockSpec((bm, OUT_PAD), lambda i: (i, 0))

    def full_spec(shape):
        return pl.BlockSpec(shape, lambda i: (0, 0))

    out_padded = pl.pallas_call(
        _mlp_kernel,
        out_shape=jax.ShapeDtypeStruct((B_pad, OUT_PAD), jnp.float32),
        grid_spec=pltpu.PrefetchScalarGridSpec(
            num_scalar_prefetch=0,
            grid=grid,
            in_specs=[
                x_spec,
                full_spec(w1.shape), full_spec(b1.shape),
                full_spec(w2.shape), full_spec(b2.shape),
                full_spec(w3.shape), full_spec(b3.shape),
                full_spec(w4.shape), full_spec(b4.shape),
                full_spec(w5.shape), full_spec(b5.shape),
            ],
            out_specs=o_spec,
        ),
        compiler_params=pltpu.CompilerParams(
            dimension_semantics=("parallel",)),
    )(x, w1, b1, w2, b2, w3, b3, w4, b4, w5, b5)

    # Slice back to real batch / real output width. The padded buffer is only
    # (B_pad, 8) f32 now, so this post-pass is cheap.
    return out_padded[:B, :OUT]


def init_params(key):
    """Deterministic init mimicking PyTorch nn.Linear default (U[-1/sqrt(fan_in), +])."""
    def linear(key, fan_in, fan_out):
        kw, kb = jax.random.split(key)
        bound = 1.0 / jnp.sqrt(jnp.float32(fan_in))
        # stored transposed: (fan_in, fan_out)
        w = jax.random.uniform(kw, (fan_in, fan_out), jnp.float32, -bound, bound)
        b = jax.random.uniform(kb, (1, fan_out), jnp.float32, -bound, bound)
        return w, b

    keys = jax.random.split(key, 5)
    w1, b1 = linear(keys[0], INPUT_NODES, NODES)
    w2, b2 = linear(keys[1], NODES, NODES)
    w3, b3 = linear(keys[2], NODES, NODES)
    w4, b4 = linear(keys[3], NODES, NODES)
    w5, b5 = linear(keys[4], NODES, OUT)

    # Zero-pad the last layer to OUT_PAD lanes (kernel slices back to OUT).
    w5p = jnp.zeros((NODES, OUT_PAD), jnp.float32).at[:, :OUT].set(w5)
    b5p = jnp.zeros((1, OUT_PAD), jnp.float32).at[:, :OUT].set(b5)

    return dict(w1=w1, b1=b1, w2=w2, b2=b2, w3=w3, b3=b3,
                w4=w4, b4=b4, w5=w5p, b5=b5p)


def reference_forward(x, params):
    """Pure-JAX reference matching the PyTorch forward."""
    h = jnp.maximum(x @ params["w1"] + params["b1"], 0.0)
    h = jnp.maximum(h @ params["w2"] + params["b2"], 0.0)
    h = jnp.maximum(h @ params["w3"] + params["b3"], 0.0)
    h = jnp.maximum(h @ params["w4"] + params["b4"], 0.0)
    out = h @ params["w5"] + params["b5"]
    return out[:, :OUT]


if __name__ == "__main__":
    key = jax.random.PRNGKey(0)
    kx, kx2, kp = jax.random.split(key, 3)
    params = init_params(kp)

    # Small smoke test: whole batch runs as a single grid step.
    B = 16
    x = jax.random.normal(kx, (B, INPUT_NODES), jnp.float32)
    out = jax.block_until_ready(mlp_forward(x, params))
    ref = reference_forward(x, params)
    assert out.shape == (B, OUT), out.shape
    assert jnp.allclose(out, ref, atol=1e-5, rtol=1e-5), "mismatch vs reference (B=16)"

    # Larger, non-multiple batch: exercises big tiles + remainder padding.
    B2 = 1000
    x2 = jax.random.normal(kx2, (B2, INPUT_NODES), jnp.float32)
    out2 = jax.block_until_ready(mlp_forward(x2, params, block_m=256))
    ref2 = reference_forward(x2, params)
    assert out2.shape == (B2, OUT), out2.shape
    assert jnp.allclose(out2, ref2, atol=1e-5, rtol=1e-5), "mismatch vs reference (B=1000)"

    print("KERNEL_OK")
</pallas_src>

<mosaic_0001>
module attributes {stable_mosaic.version = 11 : i64} {
  func.func @_mlp_kernel(%arg0: i32, %arg1: memref<16x16xf32, #tpu.memory_space<vmem>>, %arg2: memref<16x32xf32, #tpu.memory_space<vmem>>, %arg3: memref<1x32xf32, #tpu.memory_space<vmem>>, %arg4: memref<32x32xf32, #tpu.memory_space<vmem>>, %arg5: memref<1x32xf32, #tpu.memory_space<vmem>>, %arg6: memref<32x32xf32, #tpu.memory_space<vmem>>, %arg7: memref<1x32xf32, #tpu.memory_space<vmem>>, %arg8: memref<32x32xf32, #tpu.memory_space<vmem>>, %arg9: memref<1x32xf32, #tpu.memory_space<vmem>>, %arg10: memref<32x8xf32, #tpu.memory_space<vmem>>, %arg11: memref<1x8xf32, #tpu.memory_space<vmem>>, %arg12: memref<16x8xf32, #tpu.memory_space<vmem>>) attributes {dimension_semantics = [#tpu.dimension_semantics<parallel>], iteration_bounds = array<i64: 1>, scalar_prefetch = 0 : i64, scratch_operands = 0 : i64, tpu.core_type = #tpu.core_type<tc>, window_params = [{transform_indices = @transform_0, window_bounds = array<i64: 16, 16>}, {pipeline_mode = #tpu.pipeline_mode<synchronous>, transform_indices = @transform_1, window_bounds = array<i64: 16, 32>}, {pipeline_mode = #tpu.pipeline_mode<synchronous>, transform_indices = @transform_2, window_bounds = array<i64: 1, 32>}, {pipeline_mode = #tpu.pipeline_mode<synchronous>, transform_indices = @transform_3, window_bounds = array<i64: 32, 32>}, {pipeline_mode = #tpu.pipeline_mode<synchronous>, transform_indices = @transform_4, window_bounds = array<i64: 1, 32>}, {pipeline_mode = #tpu.pipeline_mode<synchronous>, transform_indices = @transform_5, window_bounds = array<i64: 32, 32>}, {pipeline_mode = #tpu.pipeline_mode<synchronous>, transform_indices = @transform_6, window_bounds = array<i64: 1, 32>}, {pipeline_mode = #tpu.pipeline_mode<synchronous>, transform_indices = @transform_7, window_bounds = array<i64: 32, 32>}, {pipeline_mode = #tpu.pipeline_mode<synchronous>, transform_indices = @transform_8, window_bounds = array<i64: 1, 32>}, {pipeline_mode = #tpu.pipeline_mode<synchronous>, transform_indices = @transform_9, window_bounds = array<i64: 32, 8>}, {pipeline_mode = #tpu.pipeline_mode<synchronous>, transform_indices = @transform_10, window_bounds = array<i64: 1, 8>}, {transform_indices = @transform_11, window_bounds = array<i64: 16, 8>}]} {
    %c0 = arith.constant 0 : index
    %c0_0 = arith.constant 0 : index
    %0 = vector.load %arg1[%c0, %c0_0] : memref<16x16xf32, #tpu.memory_space<vmem>>, vector<16x16xf32>
    %c0_1 = arith.constant 0 : index
    %c0_2 = arith.constant 0 : index
    %1 = vector.load %arg2[%c0_1, %c0_2] : memref<16x32xf32, #tpu.memory_space<vmem>>, vector<16x32xf32>
    %cst = arith.constant dense<0.000000e+00> : vector<16x32xf32>
    %2 = tpu.matmul %0, %1, %cst {dimension_numbers = #tpu.dot_dimension_numbers<[1], [0], [0], [1], [0, 0, 1, 1], [], []>} : vector<16x16xf32>, vector<16x32xf32>, vector<16x32xf32> -> vector<16x32xf32>
    %c0_3 = arith.constant 0 : index
    %c0_4 = arith.constant 0 : index
    %3 = vector.load %arg3[%c0_3, %c0_4] : memref<1x32xf32, #tpu.memory_space<vmem>>, vector<1x32xf32>
    %4 = vector.broadcast %3 : vector<1x32xf32> to vector<16x32xf32>
    %5 = arith.addf %2, %4 : vector<16x32xf32>
    %cst_5 = arith.constant 0.000000e+00 : f32
    %6 = vector.broadcast %cst_5 : f32 to vector<16x32xf32>
    %7 = arith.maximumf %5, %6 : vector<16x32xf32>
    %c0_6 = arith.constant 0 : index
    %c0_7 = arith.constant 0 : index
    %8 = vector.load %arg4[%c0_6, %c0_7] : memref<32x32xf32, #tpu.memory_space<vmem>>, vector<32x32xf32>
    %cst_8 = arith.constant dense<0.000000e+00> : vector<16x32xf32>
    %9 = tpu.matmul %7, %8, %cst_8 {dimension_numbers = #tpu.dot_dimension_numbers<[1], [0], [0], [1], [0, 0, 1, 1], [], []>} : vector<16x32xf32>, vector<32x32xf32>, vector<16x32xf32> -> vector<16x32xf32>
    %c0_9 = arith.constant 0 : index
    %c0_10 = arith.constant 0 : index
    %10 = vector.load %arg5[%c0_9, %c0_10] : memref<1x32xf32, #tpu.memory_space<vmem>>, vector<1x32xf32>
    %11 = vector.broadcast %10 : vector<1x32xf32> to vector<16x32xf32>
    %12 = arith.addf %9, %11 : vector<16x32xf32>
    %cst_11 = arith.constant 0.000000e+00 : f32
    %13 = vector.broadcast %cst_11 : f32 to vector<16x32xf32>
    %14 = arith.maximumf %12, %13 : vector<16x32xf32>
    %c0_12 = arith.constant 0 : index
    %c0_13 = arith.constant 0 : index
    %15 = vector.load %arg6[%c0_12, %c0_13] : memref<32x32xf32, #tpu.memory_space<vmem>>, vector<32x32xf32>
    %cst_14 = arith.constant dense<0.000000e+00> : vector<16x32xf32>
    %16 = tpu.matmul %14, %15, %cst_14 {dimension_numbers = #tpu.dot_dimension_numbers<[1], [0], [0], [1], [0, 0, 1, 1], [], []>} : vector<16x32xf32>, vector<32x32xf32>, vector<16x32xf32> -> vector<16x32xf32>
    %c0_15 = arith.constant 0 : index
    %c0_16 = arith.constant 0 : index
    %17 = vector.load %arg7[%c0_15, %c0_16] : memref<1x32xf32, #tpu.memory_space<vmem>>, vector<1x32xf32>
    %18 = vector.broadcast %17 : vector<1x32xf32> to vector<16x32xf32>
    %19 = arith.addf %16, %18 : vector<16x32xf32>
    %cst_17 = arith.constant 0.000000e+00 : f32
    %20 = vector.broadcast %cst_17 : f32 to vector<16x32xf32>
    %21 = arith.maximumf %19, %20 : vector<16x32xf32>
    %c0_18 = arith.constant 0 : index
    %c0_19 = arith.constant 0 : index
    %22 = vector.load %arg8[%c0_18, %c0_19] : memref<32x32xf32, #tpu.memory_space<vmem>>, vector<32x32xf32>
    %cst_20 = arith.constant dense<0.000000e+00> : vector<16x32xf32>
    %23 = tpu.matmul %21, %22, %cst_20 {dimension_numbers = #tpu.dot_dimension_numbers<[1], [0], [0], [1], [0, 0, 1, 1], [], []>} : vector<16x32xf32>, vector<32x32xf32>, vector<16x32xf32> -> vector<16x32xf32>
    %c0_21 = arith.constant 0 : index
    %c0_22 = arith.constant 0 : index
    %24 = vector.load %arg9[%c0_21, %c0_22] : memref<1x32xf32, #tpu.memory_space<vmem>>, vector<1x32xf32>
    %25 = vector.broadcast %24 : vector<1x32xf32> to vector<16x32xf32>
    %26 = arith.addf %23, %25 : vector<16x32xf32>
    %cst_23 = arith.constant 0.000000e+00 : f32
    %27 = vector.broadcast %cst_23 : f32 to vector<16x32xf32>
    %28 = arith.maximumf %26, %27 : vector<16x32xf32>
    %c0_24 = arith.constant 0 : index
    %c0_25 = arith.constant 0 : index
    %29 = vector.load %arg10[%c0_24, %c0_25] : memref<32x8xf32, #tpu.memory_space<vmem>>, vector<32x8xf32>
    %cst_26 = arith.constant dense<0.000000e+00> : vector<16x8xf32>
    %30 = tpu.matmul %28, %29, %cst_26 {dimension_numbers = #tpu.dot_dimension_numbers<[1], [0], [0], [1], [0, 0, 1, 1], [], []>} : vector<16x32xf32>, vector<32x8xf32>, vector<16x8xf32> -> vector<16x8xf32>
    %c0_27 = arith.constant 0 : index
    %c0_28 = arith.constant 0 : index
    %31 = vector.load %arg11[%c0_27, %c0_28] : memref<1x8xf32, #tpu.memory_space<vmem>>, vector<1x8xf32>
    %32 = vector.broadcast %31 : vector<1x8xf32> to vector<16x8xf32>
    %33 = arith.addf %30, %32 : vector<16x8xf32>
    %c0_29 = arith.constant 0 : index
    %c0_30 = arith.constant 0 : index
    %34 = vector.load %arg12[%c0_29, %c0_30] : memref<16x8xf32, #tpu.memory_space<vmem>>, vector<16x8xf32>
    tpu.vector_store %arg12[%c0_29, %c0_30], %33 {strides = array<i32>} : memref<16x8xf32, #tpu.memory_space<vmem>>, vector<16x8xf32>,
    return
  }
  func.func @transform_0(%arg0: i32) -> (i32, i32) {
    %c0_i32 = arith.constant 0 : i32
    %c0_i32_0 = arith.constant 0 : i32
    return %arg0, %c0_i32 : i32, i32
  }
  func.func @transform_1(%arg0: i32) -> (i32, i32) {
    %c0_i32 = arith.constant 0 : i32
    %c0_i32_0 = arith.constant 0 : i32
    %c0_i32_1 = arith.constant 0 : i32
    return %c0_i32, %c0_i32_0 : i32, i32
  }
  func.func @transform_2(%arg0: i32) -> (i32, i32) {
    %c0_i32 = arith.constant 0 : i32
    %c0_i32_0 = arith.constant 0 : i32
    %c0_i32_1 = arith.constant 0 : i32
    return %c0_i32, %c0_i32_0 : i32, i32
  }
  func.func @transform_3(%arg0: i32) -> (i32, i32) {
    %c0_i32 = arith.constant 0 : i32
    %c0_i32_0 = arith.constant 0 : i32
    %c0_i32_1 = arith.constant 0 : i32
    return %c0_i32, %c0_i32_0 : i32, i32
  }
  func.func @transform_4(%arg0: i32) -> (i32, i32) {
    %c0_i32 = arith.constant 0 : i32
    %c0_i32_0 = arith.constant 0 : i32
    %c0_i32_1 = arith.constant 0 : i32
    return %c0_i32, %c0_i32_0 : i32, i32
  }
  func.func @transform_5(%arg0: i32) -> (i32, i32) {
    %c0_i32 = arith.constant 0 : i32
    %c0_i32_0 = arith.constant 0 : i32
    %c0_i32_1 = arith.constant 0 : i32
    return %c0_i32, %c0_i32_0 : i32, i32
  }
  func.func @transform_6(%arg0: i32) -> (i32, i32) {
    %c0_i32 = arith.constant 0 : i32
    %c0_i32_0 = arith.constant 0 : i32
    %c0_i32_1 = arith.constant 0 : i32
    return %c0_i32, %c0_i32_0 : i32, i32
  }
  func.func @transform_7(%arg0: i32) -> (i32, i32) {
    %c0_i32 = arith.constant 0 : i32
    %c0_i32_0 = arith.constant 0 : i32
    %c0_i32_1 = arith.constant 0 : i32
    return %c0_i32, %c0_i32_0 : i32, i32
  }
  func.func @transform_8(%arg0: i32) -> (i32, i32) {
    %c0_i32 = arith.constant 0 : i32
    %c0_i32_0 = arith.constant 0 : i32
    %c0_i32_1 = arith.constant 0 : i32
    return %c0_i32, %c0_i32_0 : i32, i32
  }
  func.func @transform_9(%arg0: i32) -> (i32, i32) {
    %c0_i32 = arith.constant 0 : i32
    %c0_i32_0 = arith.constant 0 : i32
    %c0_i32_1 = arith.constant 0 : i32
    return %c0_i32, %c0_i32_0 : i32, i32
  }
  func.func @transform_10(%arg0: i32) -> (i32, i32) {
    %c0_i32 = arith.constant 0 : i32
    %c0_i32_0 = arith.constant 0 : i32
    %c0_i32_1 = arith.constant 0 : i32
    return %c0_i32, %c0_i32_0 : i32, i32
  }
  func.func @transform_11(%arg0: i32) -> (i32, i32) {
    %c0_i32 = arith.constant 0 : i32
    %c0_i32_0 = arith.constant 0 : i32
    return %arg0, %c0_i32 : i32, i32
  }
}

</mosaic_0001>

<bundles_post_ra>
// kernel: mlp_forward.1
= control target key start
LH: loop header
LB: loop body
LE: loop exit
PB: predicated region body
PF: predicated region fallthrough
CT: control target
= control target key end

     0   :  { %16 = vsyncpa [#allocation3], 0  ;;  %s562_s0 = inlined_call_operand.hbm [shape: f32[16,16], index: 0, kind: input, shape index: {}]   ;;  %s563_s1 = inlined_call_operand.hbm [shape: f32[16,32], index: 1, kind: input, shape index: {}]   ;;  %s564_s2 = inlined_call_operand.vmem [shape: f32[1,32], index: 2, kind: input, shape index: {}]   ;;  %s565_s3 = inlined_call_operand.vmem [shape: f32[32,32], index: 3, kind: input, shape index: {}]   ;;  %s566_s4 = inlined_call_operand.vmem [shape: f32[1,32], index: 4, kind: input, shape index: {}]   ;;  %s567_s5 = inlined_call_operand.hbm [shape: f32[32,32], index: 5, kind: input, shape index: {}]   ;;  %s568_s6 = inlined_call_operand.vmem [shape: f32[1,32], index: 6, kind: input, shape index: {}]   ;;  %s569_s7 = inlined_call_operand.hbm [shape: f32[32,32], index: 7, kind: input, shape index: {}]   ;;  %s570_s8 = inlined_call_operand.vmem [shape: f32[1,32], index: 8, kind: input, shape index: {}]   ;;  %s571_s9 = inlined_call_operand.vmem [shape: f32[32,8], index: 9, kind: input, shape index: {}]   ;;  %s572_s10 = inlined_call_operand.vmem [shape: f32[1,8], index: 10, kind: input, shape index: {}]   ;;  %s573_s11 = inlined_call_operand.vmem [shape: f32[16,8], index: 11, kind: output, shape index: {}]  }
   0x1   :  { %17 = vsyncpa [#allocation5], 0 }
   0x2   :  { %18 = vsyncpa [#allocation8], 0  ;;  %s36_s19 = sshll.u32 %s563_s1, 4  ;;  %s431_s20 = smov [#allocation4]   ;;  %s37_s19 = int_to_ptr.hbm [resolvable:$true] %s36_s19 }
   0x3   :  { %s38_s21 = sshll.u32 %s431_s20, 4  ;;  %s23_s24 = sshll.u32 %s562_s0, 4  ;;  %s39_s21 = int_to_ptr.vmem [resolvable:$true] %s38_s21  ;;  %s24_s24 = int_to_ptr.hbm [resolvable:$true] %s23_s24 }
   0x4   :  { %s432_s25 = smov 128   ;;  %s433_s26 = smov 8  }
   0x5   :  { %44 = dma.hbm_to_vmem [thread:$0]  %s37_s19, 256, %s39_s21, [#allocation5], %s432_s25, %s432_s25, %s433_s26  }
   0x6   :  { %s434_s27 = smov [#allocation2]   ;;  %s55_s12 = sshll.u32 %s567_s5, 4  ;;  %s56_s12 = int_to_ptr.hbm [resolvable:$true] %s55_s12 }
   0x7   :  { %s25_s28 = sshll.u32 %s434_s27, 4  ;;  %s70_s14 = sshll.u32 %s569_s7, 4  ;;  %s26_s28 = int_to_ptr.vmem [resolvable:$true] %s25_s28  ;;  %s71_s14 = int_to_ptr.hbm [resolvable:$true] %s70_s14 }
   0x8   :  { %31 = dma.hbm_to_vmem [thread:$0]  %s24_s24, 256, %s26_s28, [#allocation3], %s432_s25, %s432_s25, %s433_s26  }
   0x9   :  { %s435_s15 = smov [#allocation6]   ;;  %s436_s0 = smov [#allocation7]  }
   0xa   :  { %s57_s16 = sshll.u32 %s435_s15, 4  ;;  %s72_s17 = sshll.u32 %s436_s0, 4  ;;  %s58_s16 = int_to_ptr.vmem [resolvable:$true] %s57_s16  ;;  %s73_s17 = int_to_ptr.vmem [resolvable:$true] %s72_s17 }
   0xb   :  { %63 = dma.hbm_to_vmem [thread:$0]  %s56_s12, 512, %s58_s16, [#allocation5], %s432_s25, %s432_s25, %s433_s26  }
   0xc   :  { %78 = dma.hbm_to_vmem [thread:$0]  %s71_s14, 512, %s73_s17, [#allocation8], %s432_s25, %s432_s25, %s433_s26  }
   0xd   :  { %425 = dma.done.wait [#allocation3], 256  }
   0xe   :  { %426 = vsyncadd [#allocation3], 4294967040 }
   0xf   :  { %427 = dma.done.wait [#allocation5], 768  }
  0x10   :  { %428 = vsyncadd [#allocation5], 4294966528 }
  0x11   :  { %429 = dma.done.wait [#allocation8], 512  }
  0x12   :  { %430 = vsyncadd [#allocation8], 4294966784  ;;  %v104_v0 = vld [vmem:[#allocation4 + $0x8] sm:$0xff]  ;;  %v103_v1 = vld [vmem:[#allocation4] sm:$0xff]  ;;  %vm109_vm0 = vcmask 130048   ;;  %vm149_vm1 = vcmask 261120  }
  0x13   :  { %130 = vmatpush.msra.mxu0 %v104_v0  ;;  %v101_v2 = vld [vmem:[#allocation2] sm:$0xff]  ;;  %316 = vmatpush.msra.mxu1 %v104_v0  ;;  %v102_v3 = vld [vmem:[#allocation2 + $0x8] sm:$0xff]  ;;  %v144_v4 = vld [vmem:[%s565_s3 + $0x18] sm:$0xff]  ;;  %vm296_vm2 = vcmask 64512  }
  0x14   :  { %v143_v5 = vld [vmem:[%s565_s3 + $0x10] sm:$0xff]  ;;  %v142_v6 = vld [vmem:[%s565_s3 + $0x8] sm:$0xff]  ;;  %v141_v7 = vld [vmem:[%s565_s3] sm:$0xff] }
  0x15   :  { %131 = vmatpush.msra.mxu0 %v103_v1  ;;  %317 = vmatpush.msra.mxu1 %v103_v1  ;;  %v184_v8 = vld [vmem:[#allocation6 + $0x18] sm:$0xff]  ;;  %v324_v9 = vld [vmem:[%s564_s2] ss:$0 sm:$0xff]  ;;  %v183_v16 = vld [vmem:[#allocation6 + $0x10] sm:$0xff] }
  0x16   :  { %306 = vmatmul.msk.f32.vlgmr.msra.gmra.mxu0 %vm109_vm0, %v101_v2  ;;  %307 = vmatmul.msk.f32.vlgmr.msra.gmra.mxu1 %vm109_vm0, %v102_v3  ;;  %v182_v17 = vld [vmem:[#allocation6 + $0x8] sm:$0xff]  ;;  %v181_v18 = vld [vmem:[#allocation6] sm:$0xff]  ;;  %v223_v19 = vld [vmem:[#allocation7 + $0x18] sm:$0xff] }
  0x17   :  { %168 = vmatpush.msrb.mxu1 %v144_v4  ;;  %207 = vmatpush.msra.mxu2 %v184_v8  ;;  %v325_v20 = vld [vmem:[%s566_s4] ss:$0 sm:$0xff]  ;;  %v222_v27 = vld [vmem:[#allocation7 + $0x10] sm:$0xff]  ;;  %v221_v28 = vld [vmem:[#allocation7 + $0x8] sm:$0xff] }
  0x18   :  { %246 = vmatpush.msra.mxu3 %v223_v19  ;;  %v220_v29 = vld [vmem:[#allocation7] sm:$0xff]  ;;  %v262_v30 = vld [vmem:[%s571_s9 + $0x18] sm:$0xff]  ;;  %v261_v31 = vld [vmem:[%s571_s9 + $0x10] sm:$0xff] }
  0x19   :  { %169 = vmatpush.msrb.mxu1 %v143_v5  ;;  %208 = vmatpush.msra.mxu2 %v183_v16  ;;  %v326_v32 = vld [vmem:[%s568_s6] ss:$0 sm:$0xff]  ;;  %v260_v39 = vld [vmem:[%s571_s9 + $0x8] sm:$0xff] }
  0x1a   :  { %247 = vmatpush.msra.mxu3 %v222_v27  ;;  %285 = vmatpush.msrb.mxu0 %v262_v30  ;;  %v259_v40 = vld [vmem:[%s571_s9] sm:$0xff] }
  0x1b   :  { %170 = vmatpush.msrb.mxu1 %v142_v6  ;;  %209 = vmatpush.msra.mxu2 %v182_v17  ;;  %v327_v41 = vld [vmem:[%s570_s8] ss:$0 sm:$0xff] }
  0x1c   :  { %248 = vmatpush.msra.mxu3 %v221_v28  ;;  %286 = vmatpush.msrb.mxu0 %v261_v31  ;;  %v328_v48 = vld [vmem:[%s572_s10] ss:$0 sm:$0xff] }
  0x1d   :  { %171 = vmatpush.msrb.mxu1 %v141_v7  ;;  %210 = vmatpush.msra.mxu2 %v181_v18 }
  0x1e   :  { %249 = vmatpush.msra.mxu3 %v220_v29  ;;  %287 = vmatpush.msrb.mxu0 %v260_v39 }
  0x20   :  { %288 = vmatpush.msrb.mxu0 %v259_v40 }
  0x93   :  { %v133_v10 = vpop.f32.mrf.mxu0  ;;  %v136_v12 = vpop.f32.mrf.mxu1 }
  0x94   :  { %v134_v11 = vadd.f32 %v324_v9, %v133_v10  ;;  %v137_v14 = vadd.f32 %v324_v9, %v136_v12 }
  0x96   :  { %v139_v13 = vmax.f32 %v134_v11, 0.0  ;;  %v140_v15 = vmax.f32 %v137_v14, 0.0 }
  0x98   :  { %308 = vmatmul.msk.f32.vlgmr.msrb.gmra.mxu1 %vm149_vm1, %v139_v13 }
  0xa0   :  { %309 = vmatmul.msk.f32.gmra.mxu1 %vm149_vm1, %v140_v15 }
 0x115   :  { %v173_v21 = vpop.f32.mrf.mxu1 }
 0x116   :  { %v174_v22 = vadd.f32 %v325_v20, %v173_v21 }
 0x118   :  { %v179_v23 = vmax.f32 %v174_v22, 0.0 }
 0x11a   :  { %310 = vmatmul.msk.f32.vlgmr.msra.gmra.mxu2 %vm149_vm1, %v179_v23 }
 0x11d   :  { %v176_v24 = vpop.f32.mrf.mxu1 }
 0x11e   :  { %v177_v25 = vadd.f32 %v325_v20, %v176_v24 }
 0x120   :  { %v180_v26 = vmax.f32 %v177_v25, 0.0 }
 0x122   :  { %311 = vmatmul.msk.f32.gmra.mxu2 %vm149_vm1, %v180_v26 }
 0x19d   :  { %v212_v33 = vpop.f32.mrf.mxu2 }
 0x19e   :  { %v213_v34 = vadd.f32 %v326_v32, %v212_v33 }
 0x1a0   :  { %v218_v35 = vmax.f32 %v213_v34, 0.0 }
 0x1a2   :  { %312 = vmatmul.msk.f32.vlgmr.msra.gmra.mxu3 %vm149_vm1, %v218_v35 }
 0x1a5   :  { %v215_v36 = vpop.f32.mrf.mxu2 }
 0x1a6   :  { %v216_v37 = vadd.f32 %v326_v32, %v215_v36 }
 0x1a8   :  { %v219_v38 = vmax.f32 %v216_v37, 0.0 }
 0x1aa   :  { %313 = vmatmul.msk.f32.gmra.mxu3 %vm149_vm1, %v219_v38 }
 0x225   :  { %v251_v42 = vpop.f32.mrf.mxu3 }
 0x226   :  { %v252_v43 = vadd.f32 %v327_v41, %v251_v42 }
 0x228   :  { %v257_v44 = vmax.f32 %v252_v43, 0.0 }
 0x22a   :  { %314 = vmatmul.msk.f32.vlgmr.msrb.gmra.mxu0 %vm149_vm1, %v257_v44 }
 0x22d   :  { %v254_v45 = vpop.f32.mrf.mxu3 }
 0x22e   :  { %v255_v46 = vadd.f32 %v327_v41, %v254_v45 }
 0x230   :  { %v258_v47 = vmax.f32 %v255_v46, 0.0 }
 0x232   :  { %315 = vmatmul.msk.f32.gmra.mxu0 %vm149_vm1, %v258_v47 }
 0x2a7   :  { %v290_v49 = vpop.f32.mrf.mxu0 }
 0x2a8   :  { %v291_v50 = vadd.f32 %v328_v48, %v290_v49 }
 0x2aa   :  { %297 = vst.msk [vmem:[%s573_s11] sm:$0xff] %vm296_vm2, %v291_v50 }
 0x2af   :  { %v293_v51 = vpop.f32.mrf.mxu0 }
 0x2b0   :  { %v294_v52 = vadd.f32 %v328_v48, %v293_v51 }
 0x2b2   :  { %298 = vst.msk [vmem:[%s573_s11 + $0x8] sm:$0xff] %vm296_vm2, %v294_v52 }
 0x2b3   :  { %303 = vsyncpa [#allocation3], 1 }
 0x2b4   :  { %304 = vsyncpa [#allocation5], 1 }
 0x2b5   :  { %305 = vsyncpa [#allocation8], 1 }

</bundles_post_ra>
